<compile_context>
chip_gen: v6e
topology: v6e:2x2x1
jax: 0.10.0
libtpu: 0.0.40
codegen_flags: <defaults>
</compile_context>

<pallas_src>
import math
from functools import partial

import jax
import jax.numpy as jnp
from jax.experimental import pallas as pl
from jax.experimental.pallas import tpu as pltpu


def _head_kernel(x_ref, w1_ref, b1_ref, w2_ref, b2_ref, o_ref):
    # dense: [TB, H] @ [H, H] -> f32 accumulate, bias + GELU in f32
    h = jnp.dot(x_ref[...], w1_ref[...], preferred_element_type=jnp.float32)
    h = h + b1_ref[...]
    # exact GELU (erf form), matching HF get_activation('gelu') / torch default
    h = 0.5 * h * (1.0 + jax.lax.erf(h * (1.0 / math.sqrt(2.0))))
    # dropout: identity at inference
    # TODO(synk): training-mode dropout would need pltpu.prng_seed/prng_random_bits
    # out_proj: cast activations to the MXU compute dtype, accumulate in f32
    h = h.astype(w2_ref.dtype)
    out = jnp.dot(h, w2_ref[...], preferred_element_type=jnp.float32)
    out = out + b2_ref[...]
    o_ref[...] = out.astype(o_ref.dtype)


@partial(jax.jit, static_argnames=("compute_dtype", "block_b"))
def electra_classification_head(
    x, w_dense, b_dense, w_out, b_out, *, compute_dtype=jnp.bfloat16, block_b=256
):
    """x: [B, H]; w_dense: [H, H] (in, out); b_dense: [H];
    w_out: [H, L] (in, out); b_out: [L]. Returns [B, L]."""
    B, H = x.shape
    L = w_out.shape[1]

    # Lane-dense output: pad out_proj to a multiple of 128 columns (zeros).
    LP = max(128, ((L + 127) // 128) * 128)
    w_out_p = jnp.zeros((H, LP), w_out.dtype).at[:, :L].set(w_out)
    b_out_p = jnp.zeros((LP,), b_out.dtype).at[:L].set(b_out)

    # MXU inputs in compute_dtype (bf16 by default); biases stay f32.
    xc = x.astype(compute_dtype)
    w1 = w_dense.astype(compute_dtype)
    w2 = w_out_p.astype(compute_dtype)
    b1 = b_dense.reshape(1, H).astype(jnp.float32)
    b2 = b_out_p.reshape(1, LP).astype(jnp.float32)

    # Batch tile: full batch if it fits in one tile, otherwise block_b rows
    # (multiple of 8 sublanes; partial last block handled by Pallas).
    TB = B if B <= block_b else block_b
    grid = (pl.cdiv(B, TB),)

    # Rough FLOP hint so XLA schedules around the custom call sensibly.
    cost = pl.CostEstimate(
        flops=2 * B * H * (H + LP),
        transcendentals=B * H,
        bytes_accessed=(xc.size * xc.dtype.itemsize
                        + w1.size * w1.dtype.itemsize
                        + w2.size * w2.dtype.itemsize
                        + B * LP * x.dtype.itemsize),
    )

    # TODO(synk): if H grows large (>= ~2048) the resident HxH weight should be
    # K-tiled with an accumulator scratch and vmem_limit_bytes raised (v7x has
    # only 64 MiB VMEM); unnecessary at typical Electra hidden sizes in bf16.
    out = pl.pallas_call(
        _head_kernel,
        out_shape=jax.ShapeDtypeStruct((B, LP), x.dtype),
        grid_spec=pl.GridSpec(
            grid=grid,
            in_specs=[
                pl.BlockSpec((TB, H), lambda i: (i, 0)),   # x: tiled over batch
                pl.BlockSpec((H, H), lambda i: (0, 0)),    # w_dense: VMEM-resident
                pl.BlockSpec((1, H), lambda i: (0, 0)),    # b_dense
                pl.BlockSpec((H, LP), lambda i: (0, 0)),   # w_out (padded)
                pl.BlockSpec((1, LP), lambda i: (0, 0)),   # b_out (padded)
            ],
            out_specs=pl.BlockSpec((TB, LP), lambda i: (i, 0)),
        ),
        compiler_params=pltpu.CompilerParams(
            # batch tiles are independent -> shard across TensorCores
            dimension_semantics=("parallel",),
        ),
        cost_estimate=cost,
    )(xc, w1, b1, w2, b2)

    return out[:, :L]


def _reference(x, w_dense, b_dense, w_out, b_out):
    h = x @ w_dense + b_dense
    h = 0.5 * h * (1.0 + jax.lax.erf(h / jnp.sqrt(2.0)))
    return h @ w_out + b_out


if __name__ == "__main__":
    # config: hidden_size=128, num_labels=4, hidden_dropout_prob=0.1 (inactive in eval)
    batch, hidden, num_labels = 8, 128, 4

    key = jax.random.PRNGKey(0)
    kx, kw1, kb1, kw2, kb2 = jax.random.split(key, 5)

    x = jax.random.normal(kx, (batch, hidden), dtype=jnp.float32)

    # PyTorch Linear init (W [out, in], b [out]), stored pre-transposed [in, out].
    bound1 = 1.0 / math.sqrt(hidden)
    w_dense = jax.random.uniform(kw1, (hidden, hidden), jnp.float32, -bound1, bound1)
    b_dense = jax.random.uniform(kb1, (hidden,), jnp.float32, -bound1, bound1)
    w_out = jax.random.uniform(kw2, (hidden, num_labels), jnp.float32, -bound1, bound1)
    b_out = jax.random.uniform(kb2, (num_labels,), jnp.float32, -bound1, bound1)

    y_ref = _reference(x, w_dense, b_dense, w_out, b_out)

    # Optimized (bf16 MXU) path.
    y_bf16 = electra_classification_head(
        x, w_dense, b_dense, w_out, b_out, compute_dtype=jnp.bfloat16
    )
    y_bf16 = jax.block_until_ready(y_bf16)
    assert y_bf16.shape == (batch, num_labels)
    assert jnp.allclose(y_bf16, y_ref, atol=5e-2, rtol=5e-2), "bf16 path mismatch"

    # Full-precision path for strict numerical verification.
    y_f32 = electra_classification_head(
        x, w_dense, b_dense, w_out, b_out, compute_dtype=jnp.float32
    )
    y_f32 = jax.block_until_ready(y_f32)
    assert y_f32.shape == (batch, num_labels)
    assert jnp.allclose(y_f32, y_ref, atol=1e-5, rtol=1e-5), "f32 path mismatch"

    print("KERNEL_OK")
</pallas_src>

<mosaic_0001>
module attributes {stable_mosaic.version = 11 : i64} {
  func.func @_head_kernel(%arg0: i32, %arg1: memref<8x128xbf16, #tpu.memory_space<vmem>>, %arg2: memref<128x128xbf16, #tpu.memory_space<vmem>>, %arg3: memref<1x128xf32, #tpu.memory_space<vmem>>, %arg4: memref<128x128xbf16, #tpu.memory_space<vmem>>, %arg5: memref<1x128xf32, #tpu.memory_space<vmem>>, %arg6: memref<8x128xf32, #tpu.memory_space<vmem>>) attributes {dimension_semantics = [#tpu.dimension_semantics<parallel>], iteration_bounds = array<i64: 1>, scalar_prefetch = 0 : i64, scratch_operands = 0 : i64, tpu.core_type = #tpu.core_type<tc>, window_params = [{transform_indices = @transform_0, window_bounds = array<i64: 8, 128>}, {pipeline_mode = #tpu.pipeline_mode<synchronous>, transform_indices = @transform_1, window_bounds = array<i64: 128, 128>}, {pipeline_mode = #tpu.pipeline_mode<synchronous>, transform_indices = @transform_2, window_bounds = array<i64: 1, 128>}, {pipeline_mode = #tpu.pipeline_mode<synchronous>, transform_indices = @transform_3, window_bounds = array<i64: 128, 128>}, {pipeline_mode = #tpu.pipeline_mode<synchronous>, transform_indices = @transform_4, window_bounds = array<i64: 1, 128>}, {transform_indices = @transform_5, window_bounds = array<i64: 8, 128>}]} {
    %c0 = arith.constant 0 : index
    %c0_0 = arith.constant 0 : index
    %0 = vector.load %arg1[%c0, %c0_0] : memref<8x128xbf16, #tpu.memory_space<vmem>>, vector<8x128xbf16>
    %c0_1 = arith.constant 0 : index
    %c0_2 = arith.constant 0 : index
    %1 = vector.load %arg2[%c0_1, %c0_2] : memref<128x128xbf16, #tpu.memory_space<vmem>>, vector<128x128xbf16>
    %cst = arith.constant dense<0.000000e+00> : vector<8x128xf32>
    %2 = tpu.matmul %0, %1, %cst {dimension_numbers = #tpu.dot_dimension_numbers<[1], [0], [0], [1], [0, 0, 1, 1], [], []>} : vector<8x128xbf16>, vector<128x128xbf16>, vector<8x128xf32> -> vector<8x128xf32>
    %c0_3 = arith.constant 0 : index
    %c0_4 = arith.constant 0 : index
    %3 = vector.load %arg3[%c0_3, %c0_4] : memref<1x128xf32, #tpu.memory_space<vmem>>, vector<1x128xf32>
    %4 = vector.broadcast %3 : vector<1x128xf32> to vector<8x128xf32>
    %5 = arith.addf %2, %4 : vector<8x128xf32>
    %cst_5 = arith.constant 5.000000e-01 : f32
    %6 = vector.broadcast %cst_5 : f32 to vector<8x128xf32>
    %7 = arith.mulf %6, %5 : vector<8x128xf32>
    %cst_6 = arith.constant 0.707106769 : f32
    %8 = vector.broadcast %cst_6 : f32 to vector<8x128xf32>
    %9 = arith.mulf %5, %8 : vector<8x128xf32>
    %10 = math.erf %9 : vector<8x128xf32>
    %cst_7 = arith.constant 1.000000e+00 : f32
    %11 = vector.broadcast %cst_7 : f32 to vector<8x128xf32>
    %12 = arith.addf %11, %10 : vector<8x128xf32>
    %13 = arith.mulf %7, %12 : vector<8x128xf32>
    %14 = arith.truncf %13 : vector<8x128xf32> to vector<8x128xbf16>
    %c0_8 = arith.constant 0 : index
    %c0_9 = arith.constant 0 : index
    %15 = vector.load %arg4[%c0_8, %c0_9] : memref<128x128xbf16, #tpu.memory_space<vmem>>, vector<128x128xbf16>
    %cst_10 = arith.constant dense<0.000000e+00> : vector<8x128xf32>
    %16 = tpu.matmul %14, %15, %cst_10 {dimension_numbers = #tpu.dot_dimension_numbers<[1], [0], [0], [1], [0, 0, 1, 1], [], []>} : vector<8x128xbf16>, vector<128x128xbf16>, vector<8x128xf32> -> vector<8x128xf32>
    %c0_11 = arith.constant 0 : index
    %c0_12 = arith.constant 0 : index
    %17 = vector.load %arg5[%c0_11, %c0_12] : memref<1x128xf32, #tpu.memory_space<vmem>>, vector<1x128xf32>
    %18 = vector.broadcast %17 : vector<1x128xf32> to vector<8x128xf32>
    %19 = arith.addf %16, %18 : vector<8x128xf32>
    %c0_13 = arith.constant 0 : index
    %c0_14 = arith.constant 0 : index
    %20 = vector.load %arg6[%c0_13, %c0_14] : memref<8x128xf32, #tpu.memory_space<vmem>>, vector<8x128xf32>
    tpu.vector_store %arg6[%c0_13, %c0_14], %19 {strides = array<i32>} : memref<8x128xf32, #tpu.memory_space<vmem>>, vector<8x128xf32>,
    return
  }
  func.func @transform_0(%arg0: i32) -> (i32, i32) {
    %c0_i32 = arith.constant 0 : i32
    %c0_i32_0 = arith.constant 0 : i32
    return %arg0, %c0_i32 : i32, i32
  }
  func.func @transform_1(%arg0: i32) -> (i32, i32) {
    %c0_i32 = arith.constant 0 : i32
    %c0_i32_0 = arith.constant 0 : i32
    %c0_i32_1 = arith.constant 0 : i32
    return %c0_i32, %c0_i32_0 : i32, i32
  }
  func.func @transform_2(%arg0: i32) -> (i32, i32) {
    %c0_i32 = arith.constant 0 : i32
    %c0_i32_0 = arith.constant 0 : i32
    %c0_i32_1 = arith.constant 0 : i32
    return %c0_i32, %c0_i32_0 : i32, i32
  }
  func.func @transform_3(%arg0: i32) -> (i32, i32) {
    %c0_i32 = arith.constant 0 : i32
    %c0_i32_0 = arith.constant 0 : i32
    %c0_i32_1 = arith.constant 0 : i32
    return %c0_i32, %c0_i32_0 : i32, i32
  }
  func.func @transform_4(%arg0: i32) -> (i32, i32) {
    %c0_i32 = arith.constant 0 : i32
    %c0_i32_0 = arith.constant 0 : i32
    %c0_i32_1 = arith.constant 0 : i32
    return %c0_i32, %c0_i32_0 : i32, i32
  }
  func.func @transform_5(%arg0: i32) -> (i32, i32) {
    %c0_i32 = arith.constant 0 : i32
    %c0_i32_0 = arith.constant 0 : i32
    return %arg0, %c0_i32 : i32, i32
  }
}

</mosaic_0001>

<bundles_post_ra>
// kernel: electra_classification_head.1
= control target key start
LH: loop header
LB: loop body
LE: loop exit
PB: predicated region body
PF: predicated region fallthrough
CT: control target
= control target key end

     0   :  { %v351_v0 = vmov 0.0   ;;  %vm352_vm0 = vmmov 0   ;;  %s443_s1 = inlined_call_operand.vmem [shape: bf16[128,128], index: 1, kind: input, shape index: {}]   ;;  %s444_s3 = inlined_call_operand.vmem [shape: bf16[128,128], index: 3, kind: input, shape index: {}]   ;;  %s445_s0 = inlined_call_operand.vmem [shape: bf16[8,128], index: 0, kind: input, shape index: {}]   ;;  %s446_s2 = inlined_call_operand.vmem [shape: f32[1,128], index: 2, kind: input, shape index: {}]   ;;  %s447_s4 = inlined_call_operand.vmem [shape: f32[1,128], index: 4, kind: input, shape index: {}]   ;;  %s448_s5 = inlined_call_operand.vmem [shape: f32[8,128], index: 5, kind: output, shape index: {}]  }
   0x1   :  { %291 = vmatprep.subr.bf16.mxu0 %v351_v0  ;;  %v333_v1 = vld [vmem:[%s443_s1 + $0x38] sm:$0xff]   ;;  %307 = vmatprep.mubr.msk.bf16.mxu0 %vm352_vm0, %v351_v0  ;;  %v334_v2 = vld [vmem:[%s443_s1 + $0x30] sm:$0xff]   ;;  %v335_v3 = vld [vmem:[%s443_s1 + $0x28] sm:$0xff]  }
   0x2   :  { %311 = vmatprep.subr.bf16.mxu1 %v351_v0  ;;  %327 = vmatprep.mubr.msk.bf16.mxu1 %vm352_vm0, %v351_v0  ;;  %v341_v4 = vld [vmem:[%s444_s3 + $0x38] sm:$0xff]   ;;  %v336_v5 = vld [vmem:[%s443_s1 + $0x20] sm:$0xff]   ;;  %v342_v6 = vld [vmem:[%s444_s3 + $0x30] sm:$0xff]  }
   0x3   :  { %292 = vmatpush3.bf16.msra.mxu0 %v333_v1  ;;  %312 = vmatpush3.bf16.msra.mxu1 %v341_v4  ;;  %v337_v7 = vld [vmem:[%s443_s1 + $0x18] sm:$0xff]   ;;  %v338_v8 = vld [vmem:[%s443_s1 + $0x10] sm:$0xff]   ;;  %v339_v9 = vld [vmem:[%s443_s1 + $0x8] sm:$0xff]  }
   0x4   :  { %293 = vmatprep.subr.bf16.mxu0 %v351_v0  ;;  %313 = vmatprep.subr.bf16.mxu1 %v351_v0  ;;  %v340_v10 = vld [vmem:[%s443_s1] sm:$0xff]   ;;  %v343_v12 = vld [vmem:[%s444_s3 + $0x28] sm:$0xff]   ;;  %v345_v14 = vld [vmem:[%s444_s3 + $0x18] sm:$0xff]  }
   0x5   :  { %v21_v11 = vld [vmem:[%s445_s0] sm:$0xf]  ;;  %v346_v15 = vld [vmem:[%s444_s3 + $0x10] sm:$0xff]   ;;  %v347_v16 = vld [vmem:[%s444_s3 + $0x8] sm:$0xff]  }
   0x6   :  { %v344_v13 = vld [vmem:[%s444_s3 + $0x20] sm:$0xff]  }
   0x7   :  { %294 = vmatpush3.bf16.msra.mxu0 %v334_v2  ;;  %314 = vmatpush3.bf16.msra.mxu1 %v342_v6  ;;  %v348_v17 = vld [vmem:[%s444_s3] sm:$0xff]  }
   0x8   :  { %295 = vmatprep.subr.bf16.mxu0 %v351_v0  ;;  %315 = vmatprep.subr.bf16.mxu1 %v351_v0  ;;  %v255_v18 = vld [vmem:[%s446_s2] ss:$0 sm:$0xff] }
   0x9   :  { %v264_v30 = vld [vmem:[%s447_s4] ss:$0 sm:$0xff] }
   0xb   :  { %296 = vmatpush3.bf16.msra.mxu0 %v335_v3  ;;  %316 = vmatpush3.bf16.msra.mxu1 %v343_v12 }
   0xc   :  { %297 = vmatprep.subr.bf16.mxu0 %v351_v0  ;;  %317 = vmatprep.subr.bf16.mxu1 %v351_v0 }
   0xf   :  { %298 = vmatpush3.bf16.msra.mxu0 %v336_v5  ;;  %318 = vmatpush3.bf16.msra.mxu1 %v344_v13 }
  0x10   :  { %299 = vmatprep.subr.bf16.mxu0 %v351_v0  ;;  %319 = vmatprep.subr.bf16.mxu1 %v351_v0 }
  0x13   :  { %300 = vmatpush3.bf16.msra.mxu0 %v337_v7  ;;  %320 = vmatpush3.bf16.msra.mxu1 %v345_v14 }
  0x14   :  { %301 = vmatprep.subr.bf16.mxu0 %v351_v0  ;;  %321 = vmatprep.subr.bf16.mxu1 %v351_v0 }
  0x17   :  { %302 = vmatpush3.bf16.msra.mxu0 %v338_v8  ;;  %322 = vmatpush3.bf16.msra.mxu1 %v346_v15 }
  0x18   :  { %303 = vmatprep.subr.bf16.mxu0 %v351_v0  ;;  %323 = vmatprep.subr.bf16.mxu1 %v351_v0 }
  0x1b   :  { %304 = vmatpush3.bf16.msra.mxu0 %v339_v9  ;;  %324 = vmatpush3.bf16.msra.mxu1 %v347_v16 }
  0x1c   :  { %305 = vmatprep.subr.bf16.mxu0 %v351_v0  ;;  %325 = vmatprep.subr.bf16.mxu1 %v351_v0 }
  0x1f   :  { %306 = vmatpush3.bf16.msra.mxu0 %v340_v10  ;;  %326 = vmatpush3.bf16.msra.mxu1 %v348_v17 }
  0x22   :  { %308 = vmatmul.mubr.bf16.vlgmr.msra.gmra.mxu0 %v21_v11 }
  0xe2   :  { %v127_v19 = vpop.f32.mrf.mxu0 }
  0xe3   :  { %v128_v20 = vadd.f32 %v255_v18, %v127_v19 }
  0xe4   :  { %v309_v21 = vpop.f32.mrf.mxu0 }
  0xe5   :  { %v134_v22 = vmul.f32 0.70710677, %v128_v20  ;;  %v133_v26 = vmul.f32 0.5, %v128_v20 }
  0xe6   :  { %v130_v23 = vpop.f32.mrf.mxu0 }
  0xe7   :  { %349 = verf.f32 %v134_v22 }
  0xe8   :  { %v310_v24 = vpop.f32.mrf.mxu0 }
  0xf4   :  { %v350_v25 = vpop.eup %349 }
  0xf5   :  { %v136_v27 = vadd.f32 1.0, %v350_v25 }
  0xf7   :  { %v137_v28 = vmul.f32 %v136_v27, %v133_v26 }
  0xf9   :  { %v138_v29 = vpack.c.bf16 %v137_v28, %v137_v28 }
  0xfb   :  { %328 = vmatmul.mubr.bf16.vlgmr.msra.gmra.mxu1 %v138_v29 }
 0x1bb   :  { %v244_v31 = vpop.f32.mrf.mxu1 }
 0x1bc   :  { %v245_v32 = vadd.f32 %v264_v30, %v244_v31 }
 0x1bd   :  { %v329_v33 = vpop.f32.mrf.mxu1 }
 0x1be   :  { %250 = vst [vmem:[%s448_s5] sm:$0xff] %v245_v32 }
 0x1bf   :  { %v247_v34 = vpop.f32.mrf.mxu1 }
 0x1c1   :  { %v330_v35 = vpop.f32.mrf.mxu1 }

</bundles_post_ra>
